<compile_context>
chip_gen: v5e
topology: v5e:2x2
jax: 0.10.0
libtpu: 0.0.40
codegen_flags: <defaults>
</compile_context>

<pallas_src>
import functools

import numpy as np
import jax
import jax.numpy as jnp
from jax.experimental import pallas as pl
from jax.experimental.pallas import tpu as pltpu

POOL_SIZES = (1, 2, 3, 6)
NP = 64  # 1 + 4 + 9 + 36 = 50 pooled bins across all branches, padded to 64


# ----------------------------- host-side operator construction ---------------

def adaptive_pool_matrix(in_size, out_size):
    """Row-stochastic matrix reproducing torch AdaptiveAvgPool2d bins (1-D)."""
    P = np.zeros((out_size, in_size), dtype=np.float32)
    for i in range(out_size):
        start = (i * in_size) // out_size                 # floor
        end = -((-(i + 1) * in_size) // out_size)         # ceil
        P[i, start:end] = 1.0 / (end - start)
    return P


def bilinear_matrix(out_size, in_size, align_corners=True):
    """1-D bilinear interpolation operator (out_size x in_size)."""
    U = np.zeros((out_size, in_size), dtype=np.float32)
    if in_size == 1:
        U[:, 0] = 1.0
        return U
    for o in range(out_size):
        if align_corners:
            src = o * (in_size - 1) / (out_size - 1) if out_size > 1 else 0.0
        else:
            src = (o + 0.5) * in_size / out_size - 0.5
            src = min(max(src, 0.0), in_size - 1)
        lo = int(np.floor(src))
        hi = min(lo + 1, in_size - 1)
        frac = src - lo
        U[o, lo] += 1.0 - frac
        U[o, hi] += frac
    return U


@functools.lru_cache(maxsize=None)
def stacked_operators(H, W, align_corners=True):
    """All-branch pooling / upsample operators stacked into NP=64 bins."""
    HW = H * W
    MT = np.zeros((HW, NP), dtype=np.float32)       # x(C,HW) @ MT   -> pooled(C,64)
    UT = np.zeros((NP, HW), dtype=np.float32)       # z(4OC,64) @ UT -> feat(4OC,HW)
    mask = np.zeros((4, 1, NP), dtype=np.float32)   # valid bins per branch
    off = 0
    for k, s in enumerate(POOL_SIZES):
        s2 = s * s
        Ph, Pw = adaptive_pool_matrix(H, s), adaptive_pool_matrix(W, s)
        Uh = bilinear_matrix(H, s, align_corners)
        Uw = bilinear_matrix(W, s, align_corners)
        MT[:, off:off + s2] = np.kron(Ph, Pw).T     # (HW, s2)
        UT[off:off + s2, :] = np.kron(Uh, Uw).T     # (s2, HW)
        mask[k, 0, off:off + s2] = 1.0
        off += s2
    return MT, UT, mask


# ----------------------------------- kernels ----------------------------------

def _pool_conv_kernel(x_ref, mT_ref, w_ref, b_ref, mask_ref, z_ref, acc_ref):
    """Pass 1: stacked adaptive-avg-pool (reduction over HW tiles) + conv/BN/ReLU."""
    t = pl.program_id(1)

    @pl.when(t == 0)
    def _init():
        acc_ref[...] = jnp.zeros_like(acc_ref)

    # One fused pooling matmul for all 4 branches: (C, T) @ (T, NP) -> (C, NP).
    acc_ref[...] += jnp.dot(x_ref[0], mT_ref[...],
                            preferred_element_type=jnp.float32)

    @pl.when(t == pl.num_programs(1) - 1)
    def _finalize():
        pooled = acc_ref[...].astype(jnp.bfloat16)               # (C, NP)
        oc = w_ref.shape[1]
        for k in range(4):                                        # static unroll
            # BN-folded 1x1 conv + bias + ReLU on this branch's pooled bins.
            zk = jnp.dot(w_ref[k], pooled,
                         preferred_element_type=jnp.float32)      # (OC, NP)
            zk = jnp.maximum(zk + b_ref[k], 0.0) * mask_ref[k]    # zero dead bins
            z_ref[0, k * oc:(k + 1) * oc, :] = zk


def _make_upsample_concat_kernel(C):
    def kernel(x_ref, uT_ref, z_ref, o_ref):
        # Fused bilinear upsample of all 4 branches + channel concat:
        # (4*OC, NP) @ (NP, T) -> (4*OC, T), then full-lane-width stores.
        feat = jnp.dot(z_ref[0].astype(jnp.bfloat16), uT_ref[...],
                       preferred_element_type=jnp.float32)
        o_ref[0, :C, :] = x_ref[0].astype(o_ref.dtype)    # passthrough of x
        o_ref[0, C:, :] = feat.astype(o_ref.dtype)        # feat1..feat4
    return kernel


# ---------------------------------- wrapper -----------------------------------

def _pick_hw_tile(HW, C, Ctot, budget_bytes=16 * 1024 * 1024):
    """Largest lane-aligned (multiple-of-128) divisor of HW whose double-buffered
    blocks fit a conservative VMEM budget; falls back to a full-HW block."""
    best = None
    for t in range(128, HW + 1, 128):
        if HW % t:
            continue
        need = 2 * t * (2 * C + 4 * Ctot + 2 * 2 * NP)  # x(bf16)+out(f32)+ops(bf16)
        if need <= budget_bytes:
            best = t
    return best if best is not None else HW


def pyramid_pooling(x_nchw, conv_w, gamma, beta, rmean, rvar,
                    eps=1e-5, align_corners=True, tile_hw=None):
    B, C, H, W = x_nchw.shape
    OC = C // 4
    HW = H * W
    Ctot = C + 4 * OC

    MT_np, UT_np, mask_np = stacked_operators(H, W, align_corners)
    MT = jnp.asarray(MT_np, dtype=jnp.bfloat16)       # (HW, NP)
    UT = jnp.asarray(UT_np, dtype=jnp.bfloat16)       # (NP, HW)
    mask = jnp.asarray(mask_np)                       # (4, 1, NP) f32

    # Fold BatchNorm (eval mode) into the 1x1 convs.
    scale = gamma / jnp.sqrt(rvar + eps)                             # (4, OC)
    Wf = (conv_w * scale[:, :, None]).astype(jnp.bfloat16)           # (4, OC, C)
    bias = (beta - rmean * scale)[:, :, None].astype(jnp.float32)    # (4, OC, 1)

    # Channels-first flatten: no transpose needed (NCHW -> (B, C, HW) is a view).
    x_flat = x_nchw.reshape(B, C, HW).astype(jnp.bfloat16)

    T = tile_hw if tile_hw is not None else _pick_hw_tile(HW, C, Ctot)
    assert HW % T == 0 and (T % 128 == 0 or T == HW), (HW, T)
    n_t = HW // T

    # ---- pass 1: pooled accumulator over HW tiles, then conv/BN/ReLU -> z_all
    z = pl.pallas_call(
        _pool_conv_kernel,
        out_shape=jax.ShapeDtypeStruct((B, 4 * OC, NP), jnp.float32),
        grid=(B, n_t),
        in_specs=[
            pl.BlockSpec((1, C, T), lambda b, t: (b, 0, t)),         # x tile
            pl.BlockSpec((T, NP), lambda b, t: (t, 0)),              # pooling operator tile
            pl.BlockSpec((4, OC, C), lambda b, t: (0, 0, 0)),        # folded conv weights
            pl.BlockSpec((4, OC, 1), lambda b, t: (0, 0, 0)),        # folded bias
            pl.BlockSpec((4, 1, NP), lambda b, t: (0, 0, 0)),        # per-branch bin mask
        ],
        out_specs=pl.BlockSpec((1, 4 * OC, NP), lambda b, t: (b, 0, 0)),
        scratch_shapes=[pltpu.VMEM((C, NP), jnp.float32)],
        compiler_params=pltpu.CompilerParams(
            dimension_semantics=("parallel", "arbitrary"),
            vmem_limit_bytes=48 * 1024 * 1024),
    )(x_flat, MT, Wf, bias, mask)

    # ---- pass 2: fused upsample of all branches + channel concat with x
    out = pl.pallas_call(
        _make_upsample_concat_kernel(C),
        out_shape=jax.ShapeDtypeStruct((B, Ctot, HW), jnp.float32),
        grid=(B, n_t),
        in_specs=[
            pl.BlockSpec((1, C, T), lambda b, t: (b, 0, t)),         # x tile (passthrough)
            pl.BlockSpec((NP, T), lambda b, t: (0, t)),              # upsample operator tile
            pl.BlockSpec((1, 4 * OC, NP), lambda b, t: (b, 0, 0)),   # per-batch z_all
        ],
        out_specs=pl.BlockSpec((1, Ctot, T), lambda b, t: (b, 0, t)),
        compiler_params=pltpu.CompilerParams(
            dimension_semantics=("parallel", "parallel"),
            vmem_limit_bytes=48 * 1024 * 1024),
    )(x_flat, UT, z)

    return out.reshape(B, Ctot, H, W)


# --------------------------- pure numpy reference -----------------------------

def reference(x_nchw, conv_w, gamma, beta, rmean, rvar, eps=1e-5, align_corners=True):
    x = np.asarray(x_nchw, dtype=np.float64)
    B, C, H, W = x.shape
    scale = np.asarray(gamma, np.float64) / np.sqrt(np.asarray(rvar, np.float64) + eps)
    Wf = np.asarray(conv_w, np.float64) * scale[:, :, None]
    bf = np.asarray(beta, np.float64) - np.asarray(rmean, np.float64) * scale
    feats = [x]
    for k, s in enumerate(POOL_SIZES):
        Ph = adaptive_pool_matrix(H, s).astype(np.float64)
        Pw = adaptive_pool_matrix(W, s).astype(np.float64)
        Uh = bilinear_matrix(H, s, align_corners).astype(np.float64)
        Uw = bilinear_matrix(W, s, align_corners).astype(np.float64)
        pooled = np.einsum('sh,bchw,tw->bcst', Ph, x, Pw)
        z = np.einsum('oc,bcst->bost', Wf[k], pooled) + bf[k][None, :, None, None]
        z = np.maximum(z, 0.0)
        feats.append(np.einsum('hs,bost,wt->bohw', Uh, z, Uw))
    return np.concatenate(feats, axis=1)


# ------------------------------------ main -------------------------------------

if __name__ == "__main__":
    B, C, H, W = 2, 8, 16, 16
    OC = C // 4

    key = jax.random.PRNGKey(0)
    k_x, k_w, k_g, k_b, k_m, k_v = jax.random.split(key, 6)

    x = jax.random.normal(k_x, (B, C, H, W), dtype=jnp.float32)
    conv_w = jax.random.normal(k_w, (4, OC, C), dtype=jnp.float32) * 0.1
    gamma = jax.random.uniform(k_g, (4, OC), minval=0.5, maxval=1.5, dtype=jnp.float32)
    beta = jax.random.normal(k_b, (4, OC), dtype=jnp.float32) * 0.1
    rmean = jax.random.normal(k_m, (4, OC), dtype=jnp.float32) * 0.1
    rvar = jax.random.uniform(k_v, (4, OC), minval=0.5, maxval=1.5, dtype=jnp.float32)

    # tile_hw=128 -> 2 HW tiles so the pooled-accumulator (reduction) path is exercised.
    out = pyramid_pooling(x, conv_w, gamma, beta, rmean, rvar, tile_hw=128)
    out = jax.block_until_ready(out)

    assert out.shape == (B, C + 4 * OC, H, W), out.shape

    ref = reference(np.asarray(x), np.asarray(conv_w), np.asarray(gamma),
                    np.asarray(beta), np.asarray(rmean), np.asarray(rvar))
    # bf16 inputs/operators with f32 accumulation -> loosened tolerance.
    np.testing.assert_allclose(np.asarray(out), ref, rtol=2e-2, atol=2e-2)

    print("KERNEL_OK")
</pallas_src>

<mosaic_0001>
module attributes {stable_mosaic.version = 11 : i64} {
  func.func @_pool_conv_kernel(%arg0: i32, %arg1: i32, %arg2: memref<1x8x128xbf16, #tpu.memory_space<vmem>>, %arg3: memref<128x64xbf16, #tpu.memory_space<vmem>>, %arg4: memref<4x2x8xbf16, #tpu.memory_space<vmem>>, %arg5: memref<4x2x1xf32, #tpu.memory_space<vmem>>, %arg6: memref<4x1x64xf32, #tpu.memory_space<vmem>>, %arg7: memref<1x8x64xf32, #tpu.memory_space<vmem>>, %arg8: memref<8x64xf32, #tpu.memory_space<vmem>>) attributes {dimension_semantics = [#tpu.dimension_semantics<parallel>, #tpu.dimension_semantics<arbitrary>], iteration_bounds = array<i64: 2, 2>, scalar_prefetch = 0 : i64, scratch_operands = 1 : i64, tpu.core_type = #tpu.core_type<tc>, window_params = [{transform_indices = @transform_0, window_bounds = array<i64: 1, 8, 128>}, {transform_indices = @transform_1, window_bounds = array<i64: 128, 64>}, {pipeline_mode = #tpu.pipeline_mode<synchronous>, transform_indices = @transform_2, window_bounds = array<i64: 4, 2, 8>}, {pipeline_mode = #tpu.pipeline_mode<synchronous>, transform_indices = @transform_3, window_bounds = array<i64: 4, 2, 1>}, {pipeline_mode = #tpu.pipeline_mode<synchronous>, transform_indices = @transform_4, window_bounds = array<i64: 4, 1, 64>}, {transform_indices = @transform_5, window_bounds = array<i64: 1, 8, 64>}]} {
    %c0_i32 = arith.constant 0 : i32
    %0 = arith.cmpi eq, %arg1, %c0_i32 : i32
    %1 = arith.extui %0 : i1 to i32
    %c0_i32_0 = arith.constant 0 : i32
    %2 = arith.cmpi ne, %1, %c0_i32_0 : i32
    scf.if %2 {
      %cst_10 = arith.constant 0.000000e+00 : f32
      %13 = vector.broadcast %cst_10 : f32 to vector<8x64xf32>
      %c0_11 = arith.constant 0 : index
      %c0_12 = arith.constant 0 : index
      %14 = vector.load %arg8[%c0_11, %c0_12] : memref<8x64xf32, #tpu.memory_space<vmem>>, vector<8x64xf32>
      tpu.vector_store %arg8[%c0_11, %c0_12], %13 {strides = array<i32>} : memref<8x64xf32, #tpu.memory_space<vmem>>, vector<8x64xf32>,
    } else {
    }
    %c0 = arith.constant 0 : index
    %c0_1 = arith.constant 0 : index
    %3 = vector.load %arg8[%c0, %c0_1] : memref<8x64xf32, #tpu.memory_space<vmem>>, vector<8x64xf32>
    %c0_2 = arith.constant 0 : index
    %c0_3 = arith.constant 0 : index
    %c0_4 = arith.constant 0 : index
    %4 = vector.load %arg2[%c0_2, %c0_3, %c0_4] : memref<1x8x128xbf16, #tpu.memory_space<vmem>>, vector<1x8x128xbf16>
    %5 = vector.shape_cast %4 : vector<1x8x128xbf16> to vector<8x128xbf16>
    %c0_5 = arith.constant 0 : index
    %c0_6 = arith.constant 0 : index
    %6 = vector.load %arg3[%c0_5, %c0_6] : memref<128x64xbf16, #tpu.memory_space<vmem>>, vector<128x64xbf16>
    %cst = arith.constant dense<0.000000e+00> : vector<8x64xf32>
    %7 = tpu.matmul %5, %6, %cst {dimension_numbers = #tpu.dot_dimension_numbers<[1], [0], [0], [1], [0, 0, 1, 1], [], []>} : vector<8x128xbf16>, vector<128x64xbf16>, vector<8x64xf32> -> vector<8x64xf32>
    %8 = arith.addf %3, %7 : vector<8x64xf32>
    %c0_7 = arith.constant 0 : index
    %c0_8 = arith.constant 0 : index
    %9 = vector.load %arg8[%c0_7, %c0_8] : memref<8x64xf32, #tpu.memory_space<vmem>>, vector<8x64xf32>
    tpu.vector_store %arg8[%c0_7, %c0_8], %8 {strides = array<i32>} : memref<8x64xf32, #tpu.memory_space<vmem>>, vector<8x64xf32>,
    %c1_i32 = arith.constant 1 : i32
    %10 = arith.cmpi eq, %arg1, %c1_i32 : i32
    %11 = arith.extui %10 : i1 to i32
    %c0_i32_9 = arith.constant 0 : i32
    %12 = arith.cmpi ne, %11, %c0_i32_9 : i32
    scf.if %12 {
      %c0_10 = arith.constant 0 : index
      %c0_11 = arith.constant 0 : index
      %13 = vector.load %arg8[%c0_10, %c0_11] : memref<8x64xf32, #tpu.memory_space<vmem>>, vector<8x64xf32>
      %14 = arith.truncf %13 : vector<8x64xf32> to vector<8x64xbf16>
      %c0_12 = arith.constant 0 : index
      %c0_13 = arith.constant 0 : index
      %c0_14 = arith.constant 0 : index
      %15 = vector.load %arg4[%c0_12, %c0_13, %c0_14] : memref<4x2x8xbf16, #tpu.memory_space<vmem>>, vector<1x2x8xbf16>
      %16 = vector.shape_cast %15 : vector<1x2x8xbf16> to vector<2x8xbf16>
      %cst_15 = arith.constant dense<0.000000e+00> : vector<2x64xf32>
      %17 = tpu.matmul %16, %14, %cst_15 {dimension_numbers = #tpu.dot_dimension_numbers<[1], [0], [0], [1], [0, 0, 1, 1], [], []>} : vector<2x8xbf16>, vector<8x64xbf16>, vector<2x64xf32> -> vector<2x64xf32>
      %c0_16 = arith.constant 0 : index
      %c0_17 = arith.constant 0 : index
      %c0_18 = arith.constant 0 : index
      %18 = vector.load %arg5[%c0_16, %c0_17, %c0_18] : memref<4x2x1xf32, #tpu.memory_space<vmem>>, vector<1x2x1xf32>
      %19 = vector.shape_cast %18 : vector<1x2x1xf32> to vector<2x1xf32>
      %20 = vector.broadcast %19 : vector<2x1xf32> to vector<2x64xf32>
      %21 = arith.addf %17, %20 : vector<2x64xf32>
      %cst_19 = arith.constant 0.000000e+00 : f32
      %22 = vector.broadcast %cst_19 : f32 to vector<2x64xf32>
      %23 = arith.maximumf %21, %22 : vector<2x64xf32>
      %c0_20 = arith.constant 0 : index
      %c0_21 = arith.constant 0 : index
      %c0_22 = arith.constant 0 : index
      %24 = vector.load %arg6[%c0_20, %c0_21, %c0_22] : memref<4x1x64xf32, #tpu.memory_space<vmem>>, vector<1x1x64xf32>
      %25 = vector.shape_cast %24 : vector<1x1x64xf32> to vector<1x64xf32>
      %26 = vector.broadcast %25 : vector<1x64xf32> to vector<2x64xf32>
      %27 = arith.mulf %23, %26 : vector<2x64xf32>
      %c0_23 = arith.constant 0 : index
      %c0_24 = arith.constant 0 : index
      %c0_25 = arith.constant 0 : index
      %28 = vector.load %arg7[%c0_23, %c0_24, %c0_25] : memref<1x8x64xf32, #tpu.memory_space<vmem>>, vector<1x2x64xf32>
      %29 = vector.shape_cast %28 : vector<1x2x64xf32> to vector<2x64xf32>
      %30 = vector.shape_cast %27 : vector<2x64xf32> to vector<1x2x64xf32>
      tpu.vector_store %arg7[%c0_23, %c0_24, %c0_25], %30 {strides = array<i32>} : memref<1x8x64xf32, #tpu.memory_space<vmem>>, vector<1x2x64xf32>,
      %c1 = arith.constant 1 : index
      %c0_26 = arith.constant 0 : index
      %c0_27 = arith.constant 0 : index
      %31 = vector.load %arg4[%c1, %c0_26, %c0_27] : memref<4x2x8xbf16, #tpu.memory_space<vmem>>, vector<1x2x8xbf16>
      %32 = vector.shape_cast %31 : vector<1x2x8xbf16> to vector<2x8xbf16>
      %cst_28 = arith.constant dense<0.000000e+00> : vector<2x64xf32>
      %33 = tpu.matmul %32, %14, %cst_28 {dimension_numbers = #tpu.dot_dimension_numbers<[1], [0], [0], [1], [0, 0, 1, 1], [], []>} : vector<2x8xbf16>, vector<8x64xbf16>, vector<2x64xf32> -> vector<2x64xf32>
      %c1_29 = arith.constant 1 : index
      %c0_30 = arith.constant 0 : index
      %c0_31 = arith.constant 0 : index
      %34 = vector.load %arg5[%c1_29, %c0_30, %c0_31] : memref<4x2x1xf32, #tpu.memory_space<vmem>>, vector<1x2x1xf32>
      %35 = vector.shape_cast %34 : vector<1x2x1xf32> to vector<2x1xf32>
      %36 = vector.broadcast %35 : vector<2x1xf32> to vector<2x64xf32>
      %37 = arith.addf %33, %36 : vector<2x64xf32>
      %cst_32 = arith.constant 0.000000e+00 : f32
      %38 = vector.broadcast %cst_32 : f32 to vector<2x64xf32>
      %39 = arith.maximumf %37, %38 : vector<2x64xf32>
      %c1_33 = arith.constant 1 : index
      %c0_34 = arith.constant 0 : index
      %c0_35 = arith.constant 0 : index
      %40 = vector.load %arg6[%c1_33, %c0_34, %c0_35] : memref<4x1x64xf32, #tpu.memory_space<vmem>>, vector<1x1x64xf32>
      %41 = vector.shape_cast %40 : vector<1x1x64xf32> to vector<1x64xf32>
      %42 = vector.broadcast %41 : vector<1x64xf32> to vector<2x64xf32>
      %43 = arith.mulf %39, %42 : vector<2x64xf32>
      %c0_36 = arith.constant 0 : index
      %c2 = arith.constant 2 : index
      %c0_37 = arith.constant 0 : index
      %44 = vector.load %arg7[%c0_36, %c2, %c0_37] : memref<1x8x64xf32, #tpu.memory_space<vmem>>, vector<1x2x64xf32>
      %45 = vector.shape_cast %44 : vector<1x2x64xf32> to vector<2x64xf32>
      %46 = vector.shape_cast %43 : vector<2x64xf32> to vector<1x2x64xf32>
      tpu.vector_store %arg7[%c0_36, %c2, %c0_37], %46 {strides = array<i32>} : memref<1x8x64xf32, #tpu.memory_space<vmem>>, vector<1x2x64xf32>,
      %c2_38 = arith.constant 2 : index
      %c0_39 = arith.constant 0 : index
      %c0_40 = arith.constant 0 : index
      %47 = vector.load %arg4[%c2_38, %c0_39, %c0_40] : memref<4x2x8xbf16, #tpu.memory_space<vmem>>, vector<1x2x8xbf16>
      %48 = vector.shape_cast %47 : vector<1x2x8xbf16> to vector<2x8xbf16>
      %cst_41 = arith.constant dense<0.000000e+00> : vector<2x64xf32>
      %49 = tpu.matmul %48, %14, %cst_41 {dimension_numbers = #tpu.dot_dimension_numbers<[1], [0], [0], [1], [0, 0, 1, 1], [], []>} : vector<2x8xbf16>, vector<8x64xbf16>, vector<2x64xf32> -> vector<2x64xf32>
      %c2_42 = arith.constant 2 : index
      %c0_43 = arith.constant 0 : index
      %c0_44 = arith.constant 0 : index
      %50 = vector.load %arg5[%c2_42, %c0_43, %c0_44] : memref<4x2x1xf32, #tpu.memory_space<vmem>>, vector<1x2x1xf32>
      %51 = vector.shape_cast %50 : vector<1x2x1xf32> to vector<2x1xf32>
      %52 = vector.broadcast %51 : vector<2x1xf32> to vector<2x64xf32>
      %53 = arith.addf %49, %52 : vector<2x64xf32>
      %cst_45 = arith.constant 0.000000e+00 : f32
      %54 = vector.broadcast %cst_45 : f32 to vector<2x64xf32>
      %55 = arith.maximumf %53, %54 : vector<2x64xf32>
      %c2_46 = arith.constant 2 : index
      %c0_47 = arith.constant 0 : index
      %c0_48 = arith.constant 0 : index
      %56 = vector.load %arg6[%c2_46, %c0_47, %c0_48] : memref<4x1x64xf32, #tpu.memory_space<vmem>>, vector<1x1x64xf32>
      %57 = vector.shape_cast %56 : vector<1x1x64xf32> to vector<1x64xf32>
      %58 = vector.broadcast %57 : vector<1x64xf32> to vector<2x64xf32>
      %59 = arith.mulf %55, %58 : vector<2x64xf32>
      %c0_49 = arith.constant 0 : index
      %c4 = arith.constant 4 : index
      %c0_50 = arith.constant 0 : index
      %60 = vector.load %arg7[%c0_49, %c4, %c0_50] : memref<1x8x64xf32, #tpu.memory_space<vmem>>, vector<1x2x64xf32>
      %61 = vector.shape_cast %60 : vector<1x2x64xf32> to vector<2x64xf32>
      %62 = vector.shape_cast %59 : vector<2x64xf32> to vector<1x2x64xf32>
      tpu.vector_store %arg7[%c0_49, %c4, %c0_50], %62 {strides = array<i32>} : memref<1x8x64xf32, #tpu.memory_space<vmem>>, vector<1x2x64xf32>,
      %c3 = arith.constant 3 : index
      %c0_51 = arith.constant 0 : index
      %c0_52 = arith.constant 0 : index
      %63 = vector.load %arg4[%c3, %c0_51, %c0_52] : memref<4x2x8xbf16, #tpu.memory_space<vmem>>, vector<1x2x8xbf16>
      %64 = vector.shape_cast %63 : vector<1x2x8xbf16> to vector<2x8xbf16>
      %cst_53 = arith.constant dense<0.000000e+00> : vector<2x64xf32>
      %65 = tpu.matmul %64, %14, %cst_53 {dimension_numbers = #tpu.dot_dimension_numbers<[1], [0], [0], [1], [0, 0, 1, 1], [], []>} : vector<2x8xbf16>, vector<8x64xbf16>, vector<2x64xf32> -> vector<2x64xf32>
      %c3_54 = arith.constant 3 : index
      %c0_55 = arith.constant 0 : index
      %c0_56 = arith.constant 0 : index
      %66 = vector.load %arg5[%c3_54, %c0_55, %c0_56] : memref<4x2x1xf32, #tpu.memory_space<vmem>>, vector<1x2x1xf32>
      %67 = vector.shape_cast %66 : vector<1x2x1xf32> to vector<2x1xf32>
      %68 = vector.broadcast %67 : vector<2x1xf32> to vector<2x64xf32>
      %69 = arith.addf %65, %68 : vector<2x64xf32>
      %cst_57 = arith.constant 0.000000e+00 : f32
      %70 = vector.broadcast %cst_57 : f32 to vector<2x64xf32>
      %71 = arith.maximumf %69, %70 : vector<2x64xf32>
      %c3_58 = arith.constant 3 : index
      %c0_59 = arith.constant 0 : index
      %c0_60 = arith.constant 0 : index
      %72 = vector.load %arg6[%c3_58, %c0_59, %c0_60] : memref<4x1x64xf32, #tpu.memory_space<vmem>>, vector<1x1x64xf32>
      %73 = vector.shape_cast %72 : vector<1x1x64xf32> to vector<1x64xf32>
      %74 = vector.broadcast %73 : vector<1x64xf32> to vector<2x64xf32>
      %75 = arith.mulf %71, %74 : vector<2x64xf32>
      %c0_61 = arith.constant 0 : index
      %c6 = arith.constant 6 : index
      %c0_62 = arith.constant 0 : index
      %76 = vector.load %arg7[%c0_61, %c6, %c0_62] : memref<1x8x64xf32, #tpu.memory_space<vmem>>, vector<1x2x64xf32>
      %77 = vector.shape_cast %76 : vector<1x2x64xf32> to vector<2x64xf32>
      %78 = vector.shape_cast %75 : vector<2x64xf32> to vector<1x2x64xf32>
      tpu.vector_store %arg7[%c0_61, %c6, %c0_62], %78 {strides = array<i32>} : memref<1x8x64xf32, #tpu.memory_space<vmem>>, vector<1x2x64xf32>,
    } else {
    }
    return
  }
  func.func @transform_0(%arg0: i32, %arg1: i32) -> (i32, i32, i32) {
    %c0_i32 = arith.constant 0 : i32
    %c0_i32_0 = arith.constant 0 : i32
    return %arg0, %c0_i32, %arg1 : i32, i32, i32
  }
  func.func @transform_1(%arg0: i32, %arg1: i32) -> (i32, i32) {
    %c0_i32 = arith.constant 0 : i32
    %c0_i32_0 = arith.constant 0 : i32
    return %arg1, %c0_i32 : i32, i32
  }
  func.func @transform_2(%arg0: i32, %arg1: i32) -> (i32, i32, i32) {
    %c0_i32 = arith.constant 0 : i32
    %c0_i32_0 = arith.constant 0 : i32
    %c0_i32_1 = arith.constant 0 : i32
    %c0_i32_2 = arith.constant 0 : i32
    return %c0_i32, %c0_i32_0, %c0_i32_1 : i32, i32, i32
  }
  func.func @transform_3(%arg0: i32, %arg1: i32) -> (i32, i32, i32) {
    %c0_i32 = arith.constant 0 : i32
    %c0_i32_0 = arith.constant 0 : i32
    %c0_i32_1 = arith.constant 0 : i32
    %c0_i32_2 = arith.constant 0 : i32
    return %c0_i32, %c0_i32_0, %c0_i32_1 : i32, i32, i32
  }
  func.func @transform_4(%arg0: i32, %arg1: i32) -> (i32, i32, i32) {
    %c0_i32 = arith.constant 0 : i32
    %c0_i32_0 = arith.constant 0 : i32
    %c0_i32_1 = arith.constant 0 : i32
    %c0_i32_2 = arith.constant 0 : i32
    return %c0_i32, %c0_i32_0, %c0_i32_1 : i32, i32, i32
  }
  func.func @transform_5(%arg0: i32, %arg1: i32) -> (i32, i32, i32) {
    %c0_i32 = arith.constant 0 : i32
    %c0_i32_0 = arith.constant 0 : i32
    %c0_i32_1 = arith.constant 0 : i32
    return %arg0, %c0_i32, %c0_i32_0 : i32, i32, i32
  }
}

</mosaic_0001>

<bundles_post_ra>
// kernel: tpu_custom_call.1
= control target key start
LH: loop header
LB: loop body
LE: loop exit
PB: predicated region body
PF: predicated region fallthrough
CT: control target
= control target key end

     0   :  { %10 = vsyncpa [#allocation4], 0  ;;  %s1054_s0 = inlined_call_operand.vmem [shape: bf16[2,8,256], index: 0, kind: input, shape index: {}]   ;;  %s1055_s1 = inlined_call_operand.vmem [shape: bf16[256,64], index: 1, kind: input, shape index: {}]   ;;  %s1056_s2 = inlined_call_operand.vmem [shape: bf16[4,2,8], index: 2, kind: input, shape index: {}]   ;;  %s1057_s3 = inlined_call_operand.vmem [shape: f32[4,2,1], index: 3, kind: input, shape index: {}]   ;;  %s1058_s4 = inlined_call_operand.vmem [shape: f32[4,1,64], index: 4, kind: input, shape index: {}]   ;;  %s1059_s5 = inlined_call_operand.hbm [shape: f32[2,8,64], index: 5, kind: output, shape index: {}]  }
   0x1   :  { %12 = vsyncpa [#allocation4 + $0x1], 0  ;;  %s878_s18 = smov 0   ;;  %s880_s19 = smov 0  }
   0x2   :  { %s882_s20 = smov 0   ;;  %s884_s21 = smov 0  }
   0x3   :  { %s886_s22 = smov 0   ;;  %s888_s23 = smov 0  }
   0x4   :  { %s890_s24 = smov 0   ;;  %s892_s25 = smov 0  }
   0x5 LB: > { %1063 = sst [smem:[#allocation6_spill]] %s836_s23  ;;  %s602_s26 = sadd.s32 4294967295, %s844_s25   ;;  %s844_s25 = sphi %s892_s25, %s18_s25   ;;  %s840_s24 = sphi %s890_s24, %s1072_s24   ;;  %s836_s23 = sphi %s888_s23, %s1071_s23   ;;  %s832_s22 = sphi %s886_s22, %s1070_s22   ;;  %s828_s21 = sphi %s884_s21, %s1069_s21   ;;  %s824_s20 = sphi %s882_s20, %s1075_s20   ;;  %s820_s19 = sphi %s880_s19, %s1074_s19   ;;  %s816_s18 = sphi %s878_s18, %s1073_s18  }
   0x6   : > { %1064 = sst [smem:[#allocation7_spill]] %s840_s24  ;;  %s603_s27 = sadd.s32 4294967294, %s844_s25  }
   0x7   : > { %s27_s28 = sadd.s32 1, %s836_s23  ;;  %s30_s29 = sadd.s32 1, %s840_s24 }
   0x8   : > { %p28_p0 = scmp.ge.s32.totalorder %s27_s28, 2  ;;  %p164_p1 = scmp.ne.s32.totalorder %s824_s20, %s820_s19 }
   0x9   : > { %p165_p2 = scmp.eq.s32.totalorder %s602_s26, 3  ;;  %p170_p4 = scmp.ne.s32.totalorder %s820_s19, %s816_s18 }
   0xa   : > { %s1077_s28 = smov (%p28_p0, %s27_s28), 0  ;;  %s1079_s29 = smov (!%p28_p0, %s30_s29), %s840_s24 }
   0xb   : > { %1065 = sst [smem:[#allocation8_spill]] %s1077_s28  ;;  %p927_p3 = por %p165_p2, %p164_p1 }
   0xc   : > { %p32_p5 = scmp.ge.s32.totalorder %s1079_s29, 2  ;;  %p171_p6 = scmp.eq.s32.totalorder %s603_s27, 3 }
   0xd   : > { %p606_p7 = scmp.ge.s32.totalorder %s844_s25, 1  ;;  %p218_p8 = scmp.lt.s32.totalorder %s844_s25, 5 }
   0xe   : > { %s1081_s29 = smov (%p32_p5, %s1079_s29), 0  ;;  %p937_p9 = por %p171_p6, %p170_p4 }
   0xf   : > { %1067 = sst [smem:[#allocation9_spill]] %s1081_s29  ;;  %p219_p10 = pnand %p606_p7, %p218_p8 }
  0x10   : > { %s151_s7 = ssub.s32 %s840_s24, %s1081_s29  ;;  %s154_s8 = sadd.s32 1, %s824_s20 }
  0x11   : > { %p152_p11 = scmp.eq.s32.totalorder %s151_s7, 0  ;;  %222 = sbr.rel (%p219_p10) target bundleno = 365 (0x16d), region = 40 }
  0x12   : > { %s251_s10 = sand.u32 (!%p219_p10), 1, %s820_s19   ;;  %p254_p12 = scmp.lt.s32.totalorder (!%p219_p10), %s832_s22, 1 }
  0x13   : > { %s945_s9 = scalar_select %p152_p11, %s824_s20, %s154_s8  }
  0x14   : > { %s607_s11 = sshll.u32 (!%p219_p10), %s251_s10, 3  ;;  %p256_p13 = scmp.lt.s32.totalorder (!%p219_p10), %s828_s21, 1 }
  0x15   : > { %s610_s12 = sshll.u32 (!%p219_p10), %s828_s21, 4  ;;  %s961_s23 = scalar_lea.vmem (!%p219_p10), [#allocation3], %s607_s11 }
  0x16   : > { %s255_s13 = scalar_select %p254_p12, %s832_s22, 1 }
  0x17   : > { %s257_s14 = scalar_select %p256_p13, %s828_s21, 1 }
  0x18   : > { %s608_s15 = sshll.u32 %s255_s13, 1  ;;  %p263_p0 = scmp.lt.s32.totalorder %s610_s12, 31 }
  0x19   : > { %s259_s16 = sadd.s32 %s608_s15, %s257_s14  ;;  %p612_p1 = scmp.ne.s32.totalorder %s828_s21, 0 }
  0x1a   : > { %s609_s17 = sshll.u32 %s259_s16, 2  ;;  %s1083_s12 = smov (!%p263_p0, %s610_s12), 31 }
  0x1b   : > { %s261_s7 = scalar_lea.vmem %s1054_s0, %s609_s17  ;;  %s611_s8 = sshll.u32 %s1083_s12, 2 }
  0x1c   : > { %s266_s24 = scalar_lea.vmem %s1055_s1, %s611_s8  ;;  %272 = sbr.rel (%p612_p1) target bundleno = 35 (0x23), region = 44 }
  0x21   : > { %vm273_vm0 = vcmask 523264   ;;  %v846_v0 = vmov 0.0  }
  0x22   : > { %274 = vst.msk [vmem:[#allocation2] sm:$0xff] %vm273_vm0, %v846_v0 }
  0x23 PF: > { %v670_v1 = vld [vmem:[%s266_s24 + $0x38] sm:$0xff]  ;;  %v669_v2 = vld [vmem:[%s266_s24 + $0x30] sm:$0xff]  ;;  %v668_v3 = vld [vmem:[%s266_s24 + $0x28] sm:$0xff]  ;;  %vm355_vm1 = vcmask 523264   ;;  %p645_p2 = scmp.ne.s32.totalorder %s828_s21, 1 }
  0x24   : > { %341 = vmatpush.bf16.msra.mxu0 %v670_v1  ;;  %v667_v4 = vld [vmem:[%s266_s24 + $0x20] sm:$0xff]  ;;  %v666_v5 = vld [vmem:[%s266_s24 + $0x18] sm:$0xff]  ;;  %v665_v6 = vld [vmem:[%s266_s24 + $0x10] sm:$0xff] }
  0x25   : > { %v664_v7 = vld [vmem:[%s266_s24 + $0x8] sm:$0xff]  ;;  %v663_v8 = vld [vmem:[%s266_s24] sm:$0xff] }
  0x26   : > { %v276_v9 = vld [vmem:[%s261_s7] sm:$0xf] }
  0x28   : > { %342 = vmatpush.bf16.msra.mxu0 %v669_v2 }
  0x29   : > { %v275_v10 = vld [vmem:[#allocation2] sm:$0xff] }
  0x2c   : > { %343 = vmatpush.bf16.msra.mxu0 %v668_v3 }
  0x30   : > { %344 = vmatpush.bf16.msra.mxu0 %v667_v4 }
  0x34   : > { %345 = vmatpush.bf16.msra.mxu0 %v666_v5 }
  0x38   : > { %346 = vmatpush.bf16.msra.mxu0 %v665_v6 }
  0x3c   : > { %347 = vmatpush.bf16.msra.mxu0 %v664_v7 }
  0x40   : > { %348 = vmatpush.bf16.msra.mxu0 %v663_v8 }
  0x43   : > { %349 = vmatmul.bf16.vlgmr.msra.gmra.mxu0 %v276_v9 }
  0xc0   : > { %v350_v11 = vpop.f32.mrf.mxu0 }
  0xc1   : > { %v354_v12 = vadd.f32 %v350_v11, %v275_v10 }
  0xc3   : > { %356 = vst.msk [vmem:[#allocation2] sm:$0xff] %vm355_vm1, %v354_v12 }
  0xc4   : > { %360 = sbr.rel (%p645_p2) target bundleno = 350 (0x15e), region = 48 }
  0xc8   : > { %v352_v13 = vpop.f32.mrf.mxu0 }
  0xc9   : > { %vm374_vm2 = vcmask 1043456   ;;  %v847_v16 = vmov 0   ;;  %v363_v17 = vld [vmem:[%s1056_s2] sm:$0x1]  ;;  %v652_v18 = vld [vmem:[%s1057_s3 + $0x4] sm:$0x3] }
  0xca   : > { %v361_v14 = vld [vmem:[#allocation2] sm:$0xff]  ;;  %745 = vset.pattern.permute.xlu1 %v847_v16  ;;  %744 = vset.pattern.permute.xlu0 %v847_v16  ;;  %vm370_vm3 = vcmask 64512   ;;  %vm397_vm4 = vcmask 517120  }
  0xcb   : > { %v362_v15 = vpack.c.bf16 %v361_v14, %v361_v14  ;;  %v364_v19 = vld [vmem:[%s1057_s3] sm:$0x3]  ;;  %438 = vperm.xlu1 %745, %v652_v18   ;;  %v651_v22 = vld [vmem:[%s1056_s2 + $0x2] sm:$0x1]  ;;  %v655_v23 = vld [vmem:[%s1056_s2 + $0x3] sm:$0x1] }
  0xcc   : > { %v647_v21 = vld [vmem:[%s1056_s2 + $0x1] sm:$0x1]  ;;  %367 = vperm.xlu0 %744, %v364_v19   ;;  %v656_v24 = vld [vmem:[%s1057_s3 + $0x6] sm:$0x3]  ;;  %v648_v25 = vld [vmem:[%s1057_s3 + $0x2] sm:$0x3] }
  0xcd   : > { %v376_v20 = vsel %vm374_vm2, %v362_v15, 0  ;;  %v746_v32 = vld [vmem:[%s1058_s4] ss:$0 sm:$0xff]  ;;  %v747_v34 = vld [vmem:[%s1058_s4 + $0x1] ss:$0 sm:$0xff] }
  0xce   : > { %385 = vmatpush.bf16.msra.mxu0 %v376_v20  ;;  %418 = vmatpush.bf16.msra.mxu1 %v376_v20  ;;  %v748_v43 = vld [vmem:[%s1058_s4 + $0x2] ss:$0 sm:$0xff]  ;;  %v749_v45 = vld [vmem:[%s1058_s4 + $0x3] ss:$0 sm:$0xff] }
  0xcf   : > { %451 = vmatpush.bf16.msra.mxu2 %v376_v20  ;;  %484 = vmatpush.bf16.msra.mxu3 %v376_v20 }
  0xd1   : > { %646 = vmatmul.msk.bf16.vlgmr.msra.gmra.mxu0 %vm370_vm3, %v363_v17  ;;  %649 = vmatmul.msk.bf16.vlgmr.msra.gmra.mxu1 %vm370_vm3, %v647_v21 }
  0xd2   : > { %653 = vmatmul.msk.bf16.vlgmr.msra.gmra.mxu2 %vm370_vm3, %v651_v22  ;;  %657 = vmatmul.msk.bf16.vlgmr.msra.gmra.mxu3 %vm370_vm3, %v655_v23 }
  0xd3   : > { %471 = vperm.xlu1 %745, %v656_v24  }
  0xd4   : > { %405 = vperm.xlu0 %744, %v648_v25  }
 0x13d   : > { %v439_v27 = vpop.permute.xlu1 %438 }
 0x13e   : > { %v368_v26 = vpop.permute.xlu0 %367 }
 0x145   : > { %v472_v39 = vpop.permute.xlu1 %471 }
 0x146   : > { %v406_v28 = vpop.permute.xlu0 %405 }
 0x14e   : > { %v387_v29 = vpop.f32.mrf.mxu0  ;;  %v420_v30 = vpop.f32.mrf.mxu1 }
 0x14f   : > { %v388_v31 = vadd.f32 %v387_v29, %v368_v26  ;;  %v421_v33 = vadd.f32 %v420_v30, %v406_v28 }
 0x151   : > { %v391_v35 = vmax.f32 %v388_v31, 0.0  ;;  %v424_v36 = vmax.f32 %v421_v33, 0.0 }
 0x153   : > { %v396_v37 = vmul.f32 %v746_v32, %v391_v35  ;;  %v430_v38 = vmul.f32 %v747_v34, %v424_v36 }
 0x155   : > { %398 = vst.msk [vmem:[%s961_s23] sm:$0x3] %vm397_vm4, %v396_v37  ;;  %v453_v40 = vpop.f32.mrf.mxu2  ;;  %v486_v41 = vpop.f32.mrf.mxu3 }
 0x156   : > { %431 = vst.msk [vmem:[%s961_s23 + $0x2] sm:$0x3] %vm397_vm4, %v430_v38  ;;  %v454_v42 = vadd.f32 %v453_v40, %v439_v27  ;;  %v487_v44 = vadd.f32 %v486_v41, %v472_v39  ;;  %v389_v46 = vpop.f32.mrf.mxu0  ;;  %v422_v47 = vpop.f32.mrf.mxu1 }
 0x158   : > { %v457_v48 = vmax.f32 %v454_v42, 0.0  ;;  %v490_v49 = vmax.f32 %v487_v44, 0.0 }
 0x15a   : > { %v463_v50 = vmul.f32 %v748_v43, %v457_v48  ;;  %v496_v51 = vmul.f32 %v749_v45, %v490_v49 }
 0x15c   : > { %464 = vst.msk [vmem:[%s961_s23 + $0x4] sm:$0x3] %vm397_vm4, %v463_v50 }
 0x15d   : > { %497 = vst.msk [vmem:[%s961_s23 + $0x6] sm:$0x3] %vm397_vm4, %v496_v51  ;;  %v455_v52 = vpop.f32.mrf.mxu2  ;;  %v488_v53 = vpop.f32.mrf.mxu3 }
 0x15e PF: > { %s660_s16 = sshll.u32 %s832_s22, 3  ;;  %s511_s7 = sshll.u32 %s961_s23, 4  ;;  %s512_s7 = int_to_ptr.vmem [resolvable:$true] %s511_s7 }
 0x15f   : > { %s509_s27 = scalar_lea.hbm %s1059_s5, %s660_s16  ;;  %s499_s28 = scalar_lea.sflag [#allocation4], %s251_s10 }
 0x160   : > { %s513_s8 = sshll.u32 %s509_s27, 4  ;;  %s770_s22 = scalar_lea.hbm %s1059_s5, 16  ;;  %s514_s8 = int_to_ptr.hbm [resolvable:$true] %s513_s8 }
 0x161   : > { %s764_s24 = sshra.s32 %s514_s8, 4  ;;  %s765_s24 = int_to_ptr.hbm [resolvable:$true] %s764_s24 }
 0x162   : > { %s766_s29 = scalar_lea.hbm %s765_s24, 8  ;;  %p771_p7 = scmp.lt.s32.totalorder %s765_s24, %s1059_s5 }
 0x163   : > { %p767_p4 = scmp.ne.s32.totalorder %s765_s24, %s766_s29  ;;  %p772_p8 = scmp.lt.s32.totalorder %s770_s22, %s766_s29 }
 0x165   : > { %p768_p5 = pnand %p767_p4, %p927_p3  ;;  %p773_p10 = por %p772_p8, %p771_p7 }
 0x167   : > { %p769_p6 = pneg %p768_p5 }
 0x169   : > { %p774_p11 = pnand %p773_p10, %p769_p6 }
 0x16b   : > { %777 = shalt.err (!%p774_p11)
}
 0x16c   : > { %671 = dma.vmem_to_hbm [thread:$0]  (%p927_p3), %s512_s7, 128, %s514_s8, %s499_s28  }
 0x16d PF: > { %p677_p12 = scmp.ge.s32.totalorder %s844_s25, 2  ;;  %s525_s23 = sand.u32 1, %s816_s18  }
 0x16e   : > { %s526_s10 = scalar_lea.sflag [#allocation4], %s525_s23 }
 0x16f   : > { %p674_p13 = pnand %p677_p12, %p937_p9 }
 0x171   : > { %p675_p0 = pneg %p674_p13 }
 0x173   : > { %811 = dma.done.wait (%p675_p0), %s526_s10, 128  }
 0x174   : > { %813 = vsyncadd (%p675_p0), %s526_s10, 4294967168  ;;  %s18_s25 = sadd.s32 1, %s844_s25   ;;  %s1069_s21 = sld [smem:[#allocation6_spill]] }
 0x175   : > { %p15_p1 = scmp.ge.s32.totalorder %s18_s25, 6   ;;  %s1070_s22 = sld [smem:[#allocation7_spill]] }
 0x176   : > { %s1071_s23 = sld [smem:[#allocation8_spill]]  ;;  %s1073_s18 = smov %s820_s19 }
 0x177   : > { %s1072_s24 = sld [smem:[#allocation9_spill]]  ;;  %s1074_s19 = smov %s824_s20 }
 0x178   : > { %s1075_s20 = smov %s945_s9  ;;  %17 = sbr.rel (!%p15_p1) target bundleno = 5 (0x5), region = 95 }
 0x17d   :  { %532 = vsyncpa [#allocation4], 1 }
 0x17e   :  { %534 = vsyncpa [#allocation4 + $0x1], 1 }

</bundles_post_ra>
